<compile_context>
chip_gen: v7x
topology: tpu7x:2x2x1
jax: 0.10.0
libtpu: 0.0.40
codegen_flags: <defaults>
</compile_context>

<pallas_src>
import functools

import jax
import jax.numpy as jnp
from jax.experimental import pallas as pl
from jax.experimental.pallas import tpu as pltpu


def _label_smoothing_kernel(pred_ref, tgt_ref, out_ref, *,
                            confidence, off_value, n_rows, tile_rows):
    """One (TB, C) tile of rows -> (TB, 1) per-row smoothed-NLL values."""
    i = pl.program_id(0)

    pred = pred_ref[...]
    if pred.dtype != jnp.float32:            # keep math in f32 (no-op for f32 inputs)
        pred = pred.astype(jnp.float32)
    tb, c = pred.shape

    # --- weighted sum over classes, computed directly on raw pred (no shift) ---
    tgt = tgt_ref[...]                                                  # (TB, 1) int32
    col_ids = jax.lax.broadcasted_iota(jnp.int32, (tb, c), 1)           # (TB, C)
    w = jnp.where(col_ids == tgt,
                  jnp.float32(confidence), jnp.float32(off_value))      # (TB, C)
    weighted = jnp.sum(w * pred, axis=-1, keepdims=True)                # (TB, 1)

    # --- numerically stable logsumexp (independent of the weighted-sum path) ---
    row_max = jnp.max(pred, axis=-1, keepdims=True)                     # (TB, 1)
    lse = jnp.log(jnp.sum(jnp.exp(pred - row_max),
                          axis=-1, keepdims=True))                      # (TB, 1)

    # sum(w) == 1  =>  sum(-w * logp) = (row_max + lse) - sum(w * pred)
    per_row = (row_max + lse) - weighted                                # (TB, 1)

    # Mask rows past the true batch in the ragged final block.  Must stay a
    # select (not a multiply) so NaN/Inf from undefined out-of-bounds reads
    # never reaches valid output.
    row_ids = i * tile_rows + jax.lax.broadcasted_iota(jnp.int32, (tb, 1), 0)
    out_ref[...] = jnp.where(row_ids < n_rows, per_row, 0.0)


def _pick_tile_rows(batch, n_classes, itemsize):
    """Tile rows sized by the *lane-padded* VMEM footprint per row."""
    lane = 128
    pred_row = pl.cdiv(n_classes, lane) * lane * itemsize   # logits row, lane-padded
    tgt_row = lane * 4                                      # (TB,1) int32 pads to 128 lanes
    out_row = lane * 4                                      # (TB,1) f32 output block, same
    row_bytes = pred_row + tgt_row + out_row
    per_step_budget = 6 * 1024 * 1024   # x2 double-buffering => ~12 MiB steady state
    tb = max(8, (per_step_budget // row_bytes) // 8 * 8)
    if batch <= tb:
        return batch        # single full-array block (always a legal block shape)
    return tb


def label_smoothing_loss(pred, target, *, classes, smoothing=0.0, tile_rows=None):
    """pred: (B, C) float, target: (B,) int -> scalar f32 loss (mean over batch).

    Targets are assumed in [0, classes); no ignore_index (matches the PyTorch
    reference).
    """
    confidence = 1.0 - smoothing
    off_value = smoothing / (classes - 1) if classes > 1 else 0.0
    B, C = pred.shape
    assert C == classes

    tgt2d = target.astype(jnp.int32).reshape(B, 1)

    TB = tile_rows if tile_rows is not None else _pick_tile_rows(
        B, C, pred.dtype.itemsize)
    n_tiles = pl.cdiv(B, TB)

    kernel = functools.partial(
        _label_smoothing_kernel,
        confidence=confidence,
        off_value=off_value,
        n_rows=B,
        tile_rows=TB,
    )

    # TODO(synk): for vocab-scale C (>= 8k) also tile the class axis with an
    # online logsumexp; here C == classes (100 for FedCIFAR-100) fits one tile.
    per_row = pl.pallas_call(
        kernel,
        out_shape=jax.ShapeDtypeStruct((B, 1), jnp.float32),
        grid=(n_tiles,),
        in_specs=[
            pl.BlockSpec((TB, C), lambda i: (i, 0)),    # logits tile (VMEM)
            pl.BlockSpec((TB, 1), lambda i: (i, 0)),    # targets tile (VMEM)
        ],
        out_specs=pl.BlockSpec((TB, 1), lambda i: (i, 0)),   # per-row losses
        compiler_params=pltpu.CompilerParams(
            dimension_semantics=("parallel",),          # independent tiles (megacore-friendly)
            vmem_limit_bytes=32 * 1024 * 1024,
        ),
        cost_estimate=pl.CostEstimate(
            flops=6 * B * C,
            transcendentals=B * C + B,
            bytes_accessed=pred.dtype.itemsize * B * C + 4 * B + 4 * B,
        ),
    )(pred, tgt2d)

    return jnp.sum(per_row) / jnp.float32(B)


def _reference(pred, target, *, classes, smoothing):
    confidence = 1.0 - smoothing
    logp = jax.nn.log_softmax(pred.astype(jnp.float32), axis=-1)
    true_dist = jnp.full_like(logp, smoothing / (classes - 1))
    true_dist = true_dist.at[jnp.arange(pred.shape[0]), target].set(confidence)
    return jnp.mean(jnp.sum(-true_dist * logp, axis=-1))


if __name__ == "__main__":
    classes = 100       # FedCIFAR-100 -> 100 classes
    smoothing = 0.1

    key = jax.random.PRNGKey(0)
    k1, k2, k3, k4, k5, k6 = jax.random.split(key, 6)

    # Case 1: small aligned batch (single full-array tile).
    B = 8
    pred = jax.random.normal(k1, (B, classes), dtype=jnp.float32)
    target = jax.random.randint(k2, (B,), 0, classes, dtype=jnp.int32)
    loss = jax.block_until_ready(
        label_smoothing_loss(pred, target, classes=classes, smoothing=smoothing))
    ref = _reference(pred, target, classes=classes, smoothing=smoothing)
    assert jnp.allclose(loss, ref, atol=1e-5, rtol=1e-5), (loss, ref)

    # Case 2: batch not a multiple of 8 (single tile == full array dim).
    B2 = 10
    pred2 = jax.random.normal(k3, (B2, classes), dtype=jnp.float32)
    target2 = jax.random.randint(k4, (B2,), 0, classes, dtype=jnp.int32)
    loss2 = jax.block_until_ready(
        label_smoothing_loss(pred2, target2, classes=classes, smoothing=smoothing))
    ref2 = _reference(pred2, target2, classes=classes, smoothing=smoothing)
    assert jnp.allclose(loss2, ref2, atol=1e-5, rtol=1e-5), (loss2, ref2)

    # Case 3: forced small tile -> multi-tile grid with a ragged final block
    # (exercises the unpadded ragged-block masking and the parallel grid axis).
    B3 = 20
    pred3 = jax.random.normal(k5, (B3, classes), dtype=jnp.float32)
    target3 = jax.random.randint(k6, (B3,), 0, classes, dtype=jnp.int32)
    loss3 = jax.block_until_ready(
        label_smoothing_loss(pred3, target3, classes=classes, smoothing=smoothing,
                             tile_rows=8))
    ref3 = _reference(pred3, target3, classes=classes, smoothing=smoothing)
    assert jnp.allclose(loss3, ref3, atol=1e-5, rtol=1e-5), (loss3, ref3)

    print("KERNEL_OK")
</pallas_src>

<mosaic_0001>
module attributes {stable_mosaic.version = 11 : i64} {
  func.func @_label_smoothing_kernel(%arg0: i32, %arg1: memref<8x100xf32, #tpu.memory_space<vmem>>, %arg2: memref<8x1xi32, #tpu.memory_space<vmem>>, %arg3: memref<8x1xf32, #tpu.memory_space<vmem>>) attributes {dimension_semantics = [#tpu.dimension_semantics<parallel>], iteration_bounds = array<i64: 1>, scalar_prefetch = 0 : i64, scratch_operands = 0 : i64, tpu.core_type = #tpu.core_type<tc>, window_params = [{transform_indices = @transform_0, window_bounds = array<i64: 8, 100>}, {transform_indices = @transform_1, window_bounds = array<i64: 8, 1>}, {transform_indices = @transform_2, window_bounds = array<i64: 8, 1>}]} {
    %c0 = arith.constant 0 : index
    %c0_0 = arith.constant 0 : index
    %0 = vector.load %arg1[%c0, %c0_0] : memref<8x100xf32, #tpu.memory_space<vmem>>, vector<8x100xf32>
    %c0_1 = arith.constant 0 : index
    %c0_2 = arith.constant 0 : index
    %1 = vector.load %arg2[%c0_1, %c0_2] : memref<8x1xi32, #tpu.memory_space<vmem>>, vector<8x1xi32>
    %2 = tpu.iota {dimensions = array<i32: 1>} : vector<8x100xi32>
    %3 = vector.broadcast %1 : vector<8x1xi32> to vector<8x100xi32>
    %4 = arith.cmpi eq, %2, %3 : vector<8x100xi32>
    %cst = arith.constant 0.899999976 : f32
    %cst_3 = arith.constant 0.00101010106 : f32
    %5 = vector.broadcast %cst : f32 to vector<8x100xf32>
    %6 = vector.broadcast %cst_3 : f32 to vector<8x100xf32>
    %7 = arith.select %4, %5, %6 : vector<8x100xi1>, vector<8x100xf32>
    %8 = arith.mulf %7, %0 : vector<8x100xf32>
    %cst_4 = arith.constant dense<0.000000e+00> : vector<8xf32>
    %9 = vector.multi_reduction <add>, %8, %cst_4 [1] : vector<8x100xf32> to vector<8xf32>
    %10 = vector.shape_cast %9 : vector<8xf32> to vector<8x1xf32>
    %cst_5 = arith.constant dense<0xFF800000> : vector<8xf32>
    %11 = vector.multi_reduction <maximumf>, %0, %cst_5 [1] : vector<8x100xf32> to vector<8xf32>
    %12 = vector.shape_cast %11 : vector<8xf32> to vector<8x1xf32>
    %13 = vector.broadcast %12 : vector<8x1xf32> to vector<8x100xf32>
    %14 = arith.subf %0, %13 : vector<8x100xf32>
    %15 = math.exp %14 : vector<8x100xf32>
    %cst_6 = arith.constant dense<0.000000e+00> : vector<8xf32>
    %16 = vector.multi_reduction <add>, %15, %cst_6 [1] : vector<8x100xf32> to vector<8xf32>
    %17 = vector.shape_cast %16 : vector<8xf32> to vector<8x1xf32>
    %18 = math.log %17 : vector<8x1xf32>
    %19 = arith.addf %12, %18 : vector<8x1xf32>
    %20 = arith.subf %19, %10 : vector<8x1xf32>
    %c8_i32 = arith.constant 8 : i32
    %21 = arith.muli %arg0, %c8_i32 : i32
    %22 = tpu.iota {dimensions = array<i32: 0>} : vector<8x1xi32>
    %23 = vector.broadcast %21 : i32 to vector<8x1xi32>
    %24 = arith.addi %23, %22 : vector<8x1xi32>
    %c8_i32_7 = arith.constant 8 : i32
    %25 = vector.broadcast %c8_i32_7 : i32 to vector<8x1xi32>
    %26 = arith.cmpi slt, %24, %25 : vector<8x1xi32>
    %cst_8 = arith.constant 0.000000e+00 : f32
    %27 = vector.broadcast %cst_8 : f32 to vector<8x1xf32>
    %28 = arith.select %26, %20, %27 : vector<8x1xi1>, vector<8x1xf32>
    %c0_9 = arith.constant 0 : index
    %c0_10 = arith.constant 0 : index
    %29 = vector.load %arg3[%c0_9, %c0_10] : memref<8x1xf32, #tpu.memory_space<vmem>>, vector<8x1xf32>
    tpu.vector_store %arg3[%c0_9, %c0_10], %28 {strides = array<i32>} : memref<8x1xf32, #tpu.memory_space<vmem>>, vector<8x1xf32>,
    return
  }
  func.func @transform_0(%arg0: i32) -> (i32, i32) {
    %c0_i32 = arith.constant 0 : i32
    %c0_i32_0 = arith.constant 0 : i32
    return %arg0, %c0_i32 : i32, i32
  }
  func.func @transform_1(%arg0: i32) -> (i32, i32) {
    %c0_i32 = arith.constant 0 : i32
    %c0_i32_0 = arith.constant 0 : i32
    return %arg0, %c0_i32 : i32, i32
  }
  func.func @transform_2(%arg0: i32) -> (i32, i32) {
    %c0_i32 = arith.constant 0 : i32
    %c0_i32_0 = arith.constant 0 : i32
    return %arg0, %c0_i32 : i32, i32
  }
}

</mosaic_0001>

<bundles_post_ra>
// kernel: tpu_custom_call.1
= control target key start
LH: loop header
LB: loop body
LE: loop exit
PB: predicated region body
PF: predicated region fallthrough
CT: control target
= control target key end

     0   :  { %vm21_vm0 = vcmask 818176   ;;  %v58_v1 = vmov 0   ;;  %v13_v6 = vlaneseq  ;;  %v59_v10 = vmov 0.001010101   ;;  %s87_s0 = inlined_call_operand.vmem [shape: f32[8,100], index: 0, kind: input, shape index: {}]   ;;  %s88_s1 = inlined_call_operand.vmem [shape: s32[8,1], index: 1, kind: input, shape index: {}]   ;;  %s89_s2 = inlined_call_operand.vmem [shape: f32[8,1], index: 2, kind: output, shape index: {}]  }
   0x1   :  { %v11_v0 = vld [vmem:[%s87_s0] sm:$0xff]  ;;  %53 = vset.pattern.permute.xlu0 %v58_v1  ;;  %vm45_vm2 = vcmask 7168  }
   0x2   :  { %v25_v2 = vsel %vm21_vm0, %v11_v0, -inf  ;;  %v12_v3 = vld [vmem:[%s88_s1] sm:$0xff]  ;;  %v14_v8 = vand.u32 127, %v13_v6 }
   0x3   :  { %26 = vmax.xlane.f32.xlu0 %v25_v2 }
  0x19   :  { %16 = vperm.xlu0 %53, %v12_v3  }
  0x90   :  { %v27_v4 = vpop.xlane.xlu0 %26 }
  0x91   :  { %v28_v5 = vsub.f32 %v11_v0, %v27_v4 }
  0x93   :  { %v29_v7 = vmul.f32 1.442695, %v28_v5 }
  0x95   :  { %54 = vpow2.f32 %v29_v7 }
  0x98   :  { %v17_v9 = vpop.permute.xlu0 %16 }
  0x99   :  { %vm18_vm1 = vcmp.eq.s32.totalorder %v14_v8, %v17_v9 }
  0x9a   :  { %v19_v11 = vsel %vm18_vm1, 0.9, %v59_v10 }
  0x9b   :  { %v20_v12 = vmul.f32 %v19_v11, %v11_v0 }
  0x9d   :  { %v22_v15 = vsel %vm21_vm0, %v20_v12, 0.0 }
  0x9f   :  { %v55_v13 = vpop.eup %54 }
  0xa0   :  { %v31_v14 = vsel %vm21_vm0, %v55_v13, 0.0 }
  0xa1   :  { %32 = vadd.xlane.f32.xlu1 %v31_v14 }
  0xa5   :  { %23 = vadd.xlane.f32.xlu1 %v22_v15 }
 0x12e   :  { %v33_v16 = vpop.xlane.xlu1 %32 }
 0x12f   :  { %56 = vlog2.f32 %v33_v16 }
 0x132   :  { %v24_v19 = vpop.xlane.xlu1 %23 }
 0x139   :  { %v57_v17 = vpop.eup %56 }
 0x13a   :  { %v35_v18 = vmul.f32 0.6931472, %v57_v17 }
 0x13c   :  { %v36_v20 = vadd.f32 %v35_v18, %v27_v4 }
 0x13e   :  { %v37_v21 = vsub.f32 %v36_v20, %v24_v19 }
 0x140   :  { %46 = vst.msk [vmem:[%s89_s2] sm:$0xff] %vm45_vm2, %v37_v21 }

</bundles_post_ra>
